<compile_context>
chip_gen: v7x
topology: tpu7x:2x2x1
jax: 0.10.0
libtpu: 0.0.40
codegen_flags: <defaults>
</compile_context>

<pallas_src>
import functools

import jax
import jax.numpy as jnp
from jax import lax
from jax.experimental import pallas as pl
from jax.experimental.pallas import tpu as pltpu


# Contract dim 1 of lhs with dim 1 of rhs (i.e. lhs @ rhs^T) -- lets us keep
# the PyTorch (out, in) weight layout and skip wrapper-side transposes.
_CONTRACT_LAST = (((1,), (1,)), ((), ()))


def _round_up(x, m):
    return (x + m - 1) // m * m


def _lora_kernel(*refs, has_bias):
    """One (i, j, k) grid step.

    Inputs (in order):
      x_ref:    (tm, tk)   input tile
      w_ref:    (tn, tk)   base weight tile, (out, in) layout
      xa_ref:   (tm, R)    precomputed x @ A^T tile (epilogue only)
      b_ref:    (tn, R)    LoRA-B tile, (out, rank) layout, pre-scaled by `scaling`
      bias_ref: (1,  tn)   bias tile (only present when has_bias)
    Outputs / scratch:
      o_ref:    (tm, tn)   output tile
      acc_ref:  (tm, tn)   f32 base-matmul accumulator over K
    """
    if has_bias:
        x_ref, w_ref, xa_ref, b_ref, bias_ref, o_ref, acc_ref = refs
    else:
        x_ref, w_ref, xa_ref, b_ref, o_ref, acc_ref = refs
        bias_ref = None

    k = pl.program_id(2)

    @pl.when(k == 0)
    def _():
        if bias_ref is None:
            acc_ref[...] = jnp.zeros_like(acc_ref)
        else:
            # Fold bias into the accumulator init; no epilogue add needed.
            acc_ref[...] = jnp.broadcast_to(
                bias_ref[...].astype(jnp.float32), acc_ref.shape)

    # Base partial product: (tm, tk) x (tn, tk)^T -> (tm, tn), f32 MXU acc.
    acc_ref[...] += lax.dot_general(x_ref[...], w_ref[...], _CONTRACT_LAST,
                                    preferred_element_type=jnp.float32)

    @pl.when(k == pl.num_programs(2) - 1)
    def _():
        # LoRA up-projection: (tm, R) x (tn, R)^T -> (tm, tn).  B is pre-scaled
        # by `scaling`, and x @ A^T was precomputed in the wrapper.
        lora = lax.dot_general(xa_ref[...], b_ref[...], _CONTRACT_LAST,
                               preferred_element_type=jnp.float32)
        o_ref[...] = (acc_ref[...] + lora).astype(o_ref.dtype)


def prepare_lora_params(weight, bias, lora_a, lora_b, scaling, *,
                        compute_dtype=None, tn=1024, tk=1024):
    """One-time parameter preparation (hoisted out of the forward pass).

    weight:  (out_features, in_features)   -- orig.weight
    bias:    (out_features,) or None       -- orig.bias
    lora_a:  (rank, in_features)           -- lora_a.weight
    lora_b:  (out_features, rank)          -- lora_b.weight

    Casts to `compute_dtype` (explicit choice, e.g. bf16 for full-rate MXU),
    folds `scaling` into LoRA-B, and zero-pads N/K to tile multiples so the
    forward never touches W in HBM outside the kernel's streaming DMAs.
    """
    out_features, in_features = weight.shape
    rank = lora_a.shape[0]
    dtype = jnp.dtype(compute_dtype) if compute_dtype is not None else weight.dtype

    # Clamp tile sizes to alignment-rounded problem size (sublane 8 / lane 128).
    tn = min(tn, _round_up(out_features, 128))
    tk = min(tk, _round_up(in_features, 128))
    Np = _round_up(out_features, tn)
    Kp = _round_up(in_features, tk)

    wp = jnp.pad(weight.astype(dtype),
                 ((0, Np - out_features), (0, Kp - in_features)))     # (Np, Kp)
    ap = lora_a.astype(dtype)                                         # (R, K), unpadded
    bp = jnp.pad(lora_b.astype(dtype) * jnp.asarray(scaling, dtype),
                 ((0, Np - out_features), (0, 0)))                    # (Np, R), scaling folded
    bias2d = None
    if bias is not None:
        bias2d = jnp.pad(bias.astype(dtype), (0, Np - out_features)).reshape(1, Np)

    return dict(wp=wp, ap=ap, bp=bp, bias2d=bias2d,
                tn=tn, tk=tk, rank=rank, dtype=dtype,
                N=out_features, K=in_features, Np=Np, Kp=Kp)


def lora_linear_fwd(x, params, *, tm=512, w_buffer_count=2):
    """Forward pass using pre-prepared params.

    x: (..., in_features).  Output: (..., out_features) in params['dtype'].
    w_buffer_count > 2 enables deeper W pipelining (decode / small-M shapes
    that are W-streaming bound); default 2 = standard double buffering.
    """
    dtype = params["dtype"]
    N, K, Np, Kp = params["N"], params["K"], params["Np"], params["Kp"]
    tn, tk, rank = params["tn"], params["tk"], params["rank"]
    has_bias = params["bias2d"] is not None

    lead_shape = x.shape[:-1]
    x2d = x.reshape(-1, K).astype(dtype)
    M = x2d.shape[0]

    tm = min(tm, _round_up(M, 8))
    Mp = _round_up(M, tm)

    # LoRA down-projection precomputed ONCE per forward (tiny (M, rank) matmul;
    # plain XLA is fine) instead of inside every (i, j, k) grid step.
    xa = lax.dot_general(x2d, params["ap"], _CONTRACT_LAST,
                         preferred_element_type=jnp.float32).astype(dtype)

    # Zero-pad: K padding contributes 0 to the contraction; M/N padding is
    # sliced off at the end.
    xp = jnp.pad(x2d, ((0, Mp - M), (0, Kp - K)))
    xap = jnp.pad(xa, ((0, Mp - M), (0, 0)))

    grid = (Mp // tm, Np // tn, Kp // tk)

    w_spec_kwargs = {}
    if w_buffer_count != 2:
        w_spec_kwargs = dict(pipeline_mode=pl.Buffered(w_buffer_count))

    in_specs = [
        pl.BlockSpec((tm, tk), lambda i, j, k: (i, k)),                    # x
        pl.BlockSpec((tn, tk), lambda i, j, k: (j, k), **w_spec_kwargs),   # W (out, in)
        pl.BlockSpec((tm, rank), lambda i, j, k: (i, 0)),                  # x @ A^T
        pl.BlockSpec((tn, rank), lambda i, j, k: (j, 0)),                  # B * scaling
    ]
    inputs = [xp, params["wp"], xap, params["bp"]]
    if has_bias:
        in_specs.append(pl.BlockSpec((1, tn), lambda i, j, k: (0, j)))     # bias
        inputs.append(params["bias2d"])

    out_p = pl.pallas_call(
        functools.partial(_lora_kernel, has_bias=has_bias),
        out_shape=jax.ShapeDtypeStruct((Mp, Np), dtype),
        grid_spec=pltpu.PrefetchScalarGridSpec(
            num_scalar_prefetch=0,
            grid=grid,
            in_specs=in_specs,
            out_specs=pl.BlockSpec((tm, tn), lambda i, j, k: (i, j)),
            scratch_shapes=[
                pltpu.VMEM((tm, tn), jnp.float32),   # base accumulator
            ],
        ),
        compiler_params=pltpu.CompilerParams(
            dimension_semantics=("parallel", "parallel", "arbitrary"),
            # Streamed tile footprint (~18 MiB f32 / ~10 MiB bf16 at default
            # tiles) stays well under this; 48 MiB is v7x-safe (64 MiB phys).
            vmem_limit_bytes=48 * 1024 * 1024,
        ),
    )(*inputs)

    return out_p[:M, :N].reshape(*lead_shape, N)


def lora_linear(x, weight, bias, lora_a, lora_b, scaling, **fwd_kwargs):
    """Convenience one-shot wrapper (prepare + forward).  For repeated calls,
    call prepare_lora_params once and reuse the result with lora_linear_fwd."""
    params = prepare_lora_params(weight, bias, lora_a, lora_b, scaling,
                                 compute_dtype=x.dtype)
    return lora_linear_fwd(x, params, **fwd_kwargs)


def lora_linear_ref(x, weight, bias, lora_a, lora_b, scaling):
    base = x @ weight.T + (0.0 if bias is None else bias)
    lo = (x @ lora_a.T) @ lora_b.T
    return base + lo * scaling


if __name__ == "__main__":
    key = jax.random.PRNGKey(0)

    def make_case(batch, seq, in_features, out_features, rank, k):
        kx, kw, kb, ka, klb = jax.random.split(k, 5)
        x = jax.random.normal(kx, (batch, seq, in_features), dtype=jnp.float32)
        weight = jax.random.normal(kw, (out_features, in_features),
                                   dtype=jnp.float32) * 0.1
        bias = jax.random.normal(kb, (out_features,), dtype=jnp.float32) * 0.1
        lora_a = jax.random.normal(ka, (rank, in_features),
                                   dtype=jnp.float32) * 0.1
        lora_b = jax.random.normal(klb, (out_features, rank),
                                   dtype=jnp.float32) * 0.1
        return x, weight, bias, lora_a, lora_b

    k1, k2 = jax.random.split(key)
    scaling = 0.1

    # Case 1: module-consistent small shapes (batch=2, seq=8, in=32, out=32, r=4),
    # with params prepared ONCE and reused across two forwards (hoisted prep).
    x, w, b, la, lb = make_case(2, 8, 32, 32, 4, k1)
    params = prepare_lora_params(w, b, la, lb, scaling, compute_dtype=jnp.float32)
    out = jax.block_until_ready(lora_linear_fwd(x, params))
    ref = lora_linear_ref(x, w, b, la, lb, scaling)
    assert out.shape == ref.shape
    assert jnp.allclose(out, ref, atol=1e-4, rtol=1e-4), "case 1 mismatch"
    out2 = jax.block_until_ready(lora_linear_fwd(x * 2.0, params))  # reuse prepared params
    ref2 = lora_linear_ref(x * 2.0, w, b, la, lb, scaling)
    assert jnp.allclose(out2, ref2, atol=1e-4, rtol=1e-4), "case 1 (reuse) mismatch"

    # Case 2: ragged shapes (exercises padding path) and bias=None (static
    # specialization: no bias array, DMA, or add).
    x, w, b, la, lb = make_case(2, 5, 40, 24, 4, k2)
    out = jax.block_until_ready(lora_linear(x, w, None, la, lb, scaling))
    ref = lora_linear_ref(x, w, None, la, lb, scaling)
    assert out.shape == ref.shape
    assert jnp.allclose(out, ref, atol=1e-4, rtol=1e-4), "case 2 mismatch"

    # Case 3: bf16 operands (full-rate MXU path), f32 accumulation.
    x, w, b, la, lb = make_case(2, 8, 32, 32, 4, k1)
    params_bf16 = prepare_lora_params(w, b, la, lb, scaling,
                                      compute_dtype=jnp.bfloat16)
    out = jax.block_until_ready(lora_linear_fwd(x.astype(jnp.bfloat16), params_bf16))
    ref = lora_linear_ref(x, w, b, la, lb, scaling)
    assert out.shape == ref.shape
    assert jnp.allclose(out.astype(jnp.float32), ref, atol=5e-2, rtol=5e-2), \
        "case 3 (bf16) mismatch"

    print("KERNEL_OK")
</pallas_src>

<mosaic_0001>
module attributes {stable_mosaic.version = 11 : i64} {
  func.func @_lora_kernel(%arg0: i32, %arg1: i32, %arg2: i32, %arg3: memref<16x128xf32, #tpu.memory_space<vmem>>, %arg4: memref<128x128xf32, #tpu.memory_space<vmem>>, %arg5: memref<16x4xf32, #tpu.memory_space<vmem>>, %arg6: memref<128x4xf32, #tpu.memory_space<vmem>>, %arg7: memref<1x128xf32, #tpu.memory_space<vmem>>, %arg8: memref<16x128xf32, #tpu.memory_space<vmem>>, %arg9: memref<16x128xf32, #tpu.memory_space<vmem>>) attributes {dimension_semantics = [#tpu.dimension_semantics<parallel>, #tpu.dimension_semantics<parallel>, #tpu.dimension_semantics<arbitrary>], iteration_bounds = array<i64: 1, 1, 1>, scalar_prefetch = 0 : i64, scratch_operands = 1 : i64, tpu.core_type = #tpu.core_type<tc>, window_params = [{transform_indices = @transform_0, window_bounds = array<i64: 16, 128>}, {transform_indices = @transform_1, window_bounds = array<i64: 128, 128>}, {transform_indices = @transform_2, window_bounds = array<i64: 16, 4>}, {transform_indices = @transform_3, window_bounds = array<i64: 128, 4>}, {transform_indices = @transform_4, window_bounds = array<i64: 1, 128>}, {transform_indices = @transform_5, window_bounds = array<i64: 16, 128>}]} {
    %c0_i32 = arith.constant 0 : i32
    %0 = arith.cmpi eq, %arg2, %c0_i32 : i32
    %1 = arith.extui %0 : i1 to i32
    %c0_i32_0 = arith.constant 0 : i32
    %2 = arith.cmpi ne, %1, %c0_i32_0 : i32
    scf.if %2 {
      %c0_10 = arith.constant 0 : index
      %c0_11 = arith.constant 0 : index
      %12 = vector.load %arg7[%c0_10, %c0_11] : memref<1x128xf32, #tpu.memory_space<vmem>>, vector<1x128xf32>
      %13 = vector.shape_cast %12 : vector<1x128xf32> to vector<1x128xf32>
      %14 = vector.broadcast %13 : vector<1x128xf32> to vector<16x128xf32>
      %c0_12 = arith.constant 0 : index
      %c0_13 = arith.constant 0 : index
      %15 = vector.load %arg9[%c0_12, %c0_13] : memref<16x128xf32, #tpu.memory_space<vmem>>, vector<16x128xf32>
      tpu.vector_store %arg9[%c0_12, %c0_13], %14 {strides = array<i32>} : memref<16x128xf32, #tpu.memory_space<vmem>>, vector<16x128xf32>,
    } else {
    }
    %c0 = arith.constant 0 : index
    %c0_1 = arith.constant 0 : index
    %3 = vector.load %arg9[%c0, %c0_1] : memref<16x128xf32, #tpu.memory_space<vmem>>, vector<16x128xf32>
    %c0_2 = arith.constant 0 : index
    %c0_3 = arith.constant 0 : index
    %4 = vector.load %arg3[%c0_2, %c0_3] : memref<16x128xf32, #tpu.memory_space<vmem>>, vector<16x128xf32>
    %c0_4 = arith.constant 0 : index
    %c0_5 = arith.constant 0 : index
    %5 = vector.load %arg4[%c0_4, %c0_5] : memref<128x128xf32, #tpu.memory_space<vmem>>, vector<128x128xf32>
    %cst = arith.constant dense<0.000000e+00> : vector<16x128xf32>
    %6 = tpu.matmul %4, %5, %cst {dimension_numbers = #tpu.dot_dimension_numbers<[1], [1], [0], [0], [0, 0, 1, 0], [], []>} : vector<16x128xf32>, vector<128x128xf32>, vector<16x128xf32> -> vector<16x128xf32>
    %7 = arith.addf %3, %6 : vector<16x128xf32>
    %c0_6 = arith.constant 0 : index
    %c0_7 = arith.constant 0 : index
    %8 = vector.load %arg9[%c0_6, %c0_7] : memref<16x128xf32, #tpu.memory_space<vmem>>, vector<16x128xf32>
    tpu.vector_store %arg9[%c0_6, %c0_7], %7 {strides = array<i32>} : memref<16x128xf32, #tpu.memory_space<vmem>>, vector<16x128xf32>,
    %c0_i32_8 = arith.constant 0 : i32
    %9 = arith.cmpi eq, %arg2, %c0_i32_8 : i32
    %10 = arith.extui %9 : i1 to i32
    %c0_i32_9 = arith.constant 0 : i32
    %11 = arith.cmpi ne, %10, %c0_i32_9 : i32
    scf.if %11 {
      %c0_10 = arith.constant 0 : index
      %c0_11 = arith.constant 0 : index
      %12 = vector.load %arg5[%c0_10, %c0_11] : memref<16x4xf32, #tpu.memory_space<vmem>>, vector<16x4xf32>
      %c0_12 = arith.constant 0 : index
      %c0_13 = arith.constant 0 : index
      %13 = vector.load %arg6[%c0_12, %c0_13] : memref<128x4xf32, #tpu.memory_space<vmem>>, vector<128x4xf32>
      %cst_14 = arith.constant dense<0.000000e+00> : vector<16x128xf32>
      %14 = tpu.matmul %12, %13, %cst_14 {dimension_numbers = #tpu.dot_dimension_numbers<[1], [1], [0], [0], [0, 0, 1, 0], [], []>} : vector<16x4xf32>, vector<128x4xf32>, vector<16x128xf32> -> vector<16x128xf32>
      %c0_15 = arith.constant 0 : index
      %c0_16 = arith.constant 0 : index
      %15 = vector.load %arg9[%c0_15, %c0_16] : memref<16x128xf32, #tpu.memory_space<vmem>>, vector<16x128xf32>
      %16 = arith.addf %15, %14 : vector<16x128xf32>
      %c0_17 = arith.constant 0 : index
      %c0_18 = arith.constant 0 : index
      %17 = vector.load %arg8[%c0_17, %c0_18] : memref<16x128xf32, #tpu.memory_space<vmem>>, vector<16x128xf32>
      tpu.vector_store %arg8[%c0_17, %c0_18], %16 {strides = array<i32>} : memref<16x128xf32, #tpu.memory_space<vmem>>, vector<16x128xf32>,
    } else {
    }
    return
  }
  func.func @transform_0(%arg0: i32, %arg1: i32, %arg2: i32) -> (i32, i32) {
    %c0_i32 = arith.constant 0 : i32
    return %arg0, %arg2 : i32, i32
  }
  func.func @transform_1(%arg0: i32, %arg1: i32, %arg2: i32) -> (i32, i32) {
    %c0_i32 = arith.constant 0 : i32
    return %arg1, %arg2 : i32, i32
  }
  func.func @transform_2(%arg0: i32, %arg1: i32, %arg2: i32) -> (i32, i32) {
    %c0_i32 = arith.constant 0 : i32
    %c0_i32_0 = arith.constant 0 : i32
    return %arg0, %c0_i32 : i32, i32
  }
  func.func @transform_3(%arg0: i32, %arg1: i32, %arg2: i32) -> (i32, i32) {
    %c0_i32 = arith.constant 0 : i32
    %c0_i32_0 = arith.constant 0 : i32
    return %arg1, %c0_i32 : i32, i32
  }
  func.func @transform_4(%arg0: i32, %arg1: i32, %arg2: i32) -> (i32, i32) {
    %c0_i32 = arith.constant 0 : i32
    %c0_i32_0 = arith.constant 0 : i32
    return %c0_i32, %arg1 : i32, i32
  }
  func.func @transform_5(%arg0: i32, %arg1: i32, %arg2: i32) -> (i32, i32) {
    %c0_i32 = arith.constant 0 : i32
    return %arg0, %arg1 : i32, i32
  }
}

</mosaic_0001>

<bundles_post_ra>
// kernel: tpu_custom_call.1
= control target key start
LH: loop header
LB: loop body
LE: loop exit
PB: predicated region body
PF: predicated region fallthrough
CT: control target
= control target key end

     0   :  { %vm154_vm0 = vcmask 31744   ;;  %s738_s0 = inlined_call_operand.vmem [shape: f32[16,128], index: 0, kind: input, shape index: {}]   ;;  %s739_s1 = inlined_call_operand.vmem [shape: f32[128,128], index: 1, kind: input, shape index: {}]   ;;  %s740_s2 = inlined_call_operand.vmem [shape: f32[16,4], index: 2, kind: input, shape index: {}]   ;;  %s741_s3 = inlined_call_operand.vmem [shape: f32[128,4], index: 3, kind: input, shape index: {}]   ;;  %s742_s4 = inlined_call_operand.vmem [shape: f32[1,128], index: 4, kind: input, shape index: {}]   ;;  %s743_s5 = inlined_call_operand.hbm [shape: f32[16,128], index: 5, kind: output, shape index: {}]  }
   0x1   :  { %v38_v0 = vld [vmem:[%s739_s1] sm:$0xff]  ;;  %v39_v1 = vld [vmem:[%s739_s1 + $0x8] sm:$0xff]  ;;  %vm589_vm1 = vmpackc.low %vm154_vm0, %vm154_vm0 }
   0x2   :  { %v138_v2 = vld [vmem:[%s741_s3] sm:$0xff]  ;;  %v431_v3 = vpack.c.bf16 %v39_v1, %v38_v0  ;;  %v139_v4 = vld [vmem:[%s741_s3 + $0x8] sm:$0xff]  ;;  %v40_v6 = vld [vmem:[%s739_s1 + $0x10] sm:$0xff] }
   0x3   :  { %v463_v7 = vpack.c.bf16 %v139_v4, %v138_v2  ;;  %v41_v8 = vld [vmem:[%s739_s1 + $0x18] sm:$0xff]  ;;  %v140_v9 = vld [vmem:[%s741_s3 + $0x10] sm:$0xff]  ;;  %v42_v13 = vld [vmem:[%s739_s1 + $0x20] sm:$0xff] }
   0x4   :  { %v141_v10 = vld [vmem:[%s741_s3 + $0x18] sm:$0xff]  ;;  %432 = vmatprep.subr.bf16.mxu1 %v431_v3  ;;  %v435_v11 = vpack.c.bf16 %v41_v8, %v40_v6  ;;  %v43_v14 = vld [vmem:[%s739_s1 + $0x28] sm:$0xff]  ;;  %v142_v15 = vld [vmem:[%s741_s3 + $0x20] sm:$0xff] }
   0x5   :  { %v469_v12 = vpack.c.bf16 %v141_v10, %v140_v9  ;;  %434 = vmatpush3.bf16.xpose.msra.mxu1 %v431_v3  ;;  %465 = vmatprep.subr.msk.bf16.mxu0 %vm589_vm1, %v463_v7  ;;  %v143_v16 = vld [vmem:[%s741_s3 + $0x28] sm:$0xff]  ;;  %v439_v17 = vpack.c.bf16 %v43_v14, %v42_v13  ;;  %v36_v19 = vld [vmem:[%s738_s0] sm:$0xff] }
   0x6   :  { %468 = vmatpush3.bf16.xpose.msk.msra.mxu0 %vm589_vm1, %v463_v7  ;;  %436 = vmatprep.subr.bf16.mxu1 %v435_v11  ;;  %v475_v18 = vpack.c.bf16 %v143_v16, %v142_v15  ;;  %v136_v20 = vld [vmem:[%s740_s2] sm:$0xff] }
   0x7   :  { %471 = vmatprep.subr.msk.bf16.mxu0 %vm589_vm1, %v469_v12  ;;  %393 = vmatprep.mubr.f32.mxu1 %v36_v19 }
   0xd   :  { %438 = vmatpush3.bf16.xpose.msra.mxu1 %v435_v11 }
   0xe   :  { %10 = vsyncpa [#allocation4], 0  ;;  %474 = vmatpush3.bf16.xpose.msk.msra.mxu0 %vm589_vm1, %v469_v12  ;;  %440 = vmatprep.subr.bf16.mxu1 %v439_v17  ;;  %v44_v21 = vld [vmem:[%s739_s1 + $0x30] sm:$0xff]  ;;  %v45_v22 = vld [vmem:[%s739_s1 + $0x38] sm:$0xff]  ;;  %s542_s15 = smov [#allocation3]  }
   0xf   :  { %477 = vmatprep.subr.msk.bf16.mxu0 %vm589_vm1, %v475_v18  ;;  %428 = vmatprep.mubr.msk.f32.mxu0 %vm154_vm0, %v136_v20  ;;  %v144_v23 = vld [vmem:[%s741_s3 + $0x30] sm:$0xff]  ;;  %v145_v24 = vld [vmem:[%s741_s3 + $0x38] sm:$0xff]  ;;  %v443_v25 = vpack.c.bf16 %v45_v22, %v44_v21  ;;  %v46_v27 = vld [vmem:[%s739_s1 + $0x40] sm:$0xff]  ;;  %s295_s16 = sshll.u32 %s542_s15, 4  ;;  %s296_s16 = int_to_ptr.vmem [resolvable:$true] %s295_s16 }
  0x10   :  { %v481_v26 = vpack.c.bf16 %v145_v24, %v144_v23  ;;  %v47_v28 = vld [vmem:[%s739_s1 + $0x48] sm:$0xff]  ;;  %v146_v29 = vld [vmem:[%s741_s3 + $0x40] sm:$0xff]  ;;  %v48_v33 = vld [vmem:[%s739_s1 + $0x50] sm:$0xff]  ;;  %p523_p1 = scmp.lt.s32.totalorder %s296_s16, %s296_s16 }
  0x11   :  { %v147_v30 = vld [vmem:[%s741_s3 + $0x48] sm:$0xff]  ;;  %v447_v31 = vpack.c.bf16 %v47_v28, %v46_v27  ;;  %v49_v34 = vld [vmem:[%s739_s1 + $0x58] sm:$0xff]  ;;  %v148_v35 = vld [vmem:[%s741_s3 + $0x50] sm:$0xff] }
  0x12   :  { %v487_v32 = vpack.c.bf16 %v147_v30, %v146_v29  ;;  %v149_v36 = vld [vmem:[%s741_s3 + $0x58] sm:$0xff]  ;;  %v451_v37 = vpack.c.bf16 %v49_v34, %v48_v33  ;;  %v50_v39 = vld [vmem:[%s739_s1 + $0x60] sm:$0xff]  ;;  %v51_v40 = vld [vmem:[%s739_s1 + $0x68] sm:$0xff] }
  0x13   :  { %v493_v38 = vpack.c.bf16 %v149_v36, %v148_v35  ;;  %v150_v41 = vld [vmem:[%s741_s3 + $0x60] sm:$0xff]  ;;  %v151_v42 = vld [vmem:[%s741_s3 + $0x68] sm:$0xff]  ;;  %v455_v43 = vpack.c.bf16 %v51_v40, %v50_v39  ;;  %v52_v45 = vld [vmem:[%s739_s1 + $0x70] sm:$0xff] }
  0x14   :  { %v499_v44 = vpack.c.bf16 %v151_v42, %v150_v41  ;;  %v53_v46 = vld [vmem:[%s739_s1 + $0x78] sm:$0xff]  ;;  %v152_v47 = vld [vmem:[%s741_s3 + $0x70] sm:$0xff]  ;;  %v37_v51 = vld [vmem:[%s738_s0 + $0x8] sm:$0xff]  ;;  %s518_s0 = scalar_lea.vmem %s296_s16, 256 }
  0x15   :  { %442 = vmatpush3.bf16.xpose.msra.mxu1 %v439_v17  ;;  %v153_v48 = vld [vmem:[%s741_s3 + $0x78] sm:$0xff]  ;;  %v459_v49 = vpack.c.bf16 %v53_v46, %v52_v45  ;;  %v137_v52 = vld [vmem:[%s740_s2 + $0x8] sm:$0xff]  ;;  %v306_v53 = vld [vmem:[%s742_s4] ss:$0 sm:$0xff]  ;;  %p519_p0 = scmp.ne.s32.totalorder %s296_s16, %s518_s0  ;;  %p524_p2 = scmp.lt.s32.totalorder %s518_s0, %s518_s0 }
  0x16   :  { %480 = vmatpush3.bf16.xpose.msk.msra.mxu0 %vm589_vm1, %v475_v18  ;;  %444 = vmatprep.subr.bf16.mxu1 %v443_v25  ;;  %v505_v50 = vpack.c.bf16 %v153_v48, %v152_v47 }
  0x17   :  { %483 = vmatprep.subr.msk.bf16.mxu0 %vm589_vm1, %v481_v26  ;;  %p525_p3 = por %p524_p2, %p523_p1 }
  0x19   :  { %p526_p4 = pnand %p525_p3, %p519_p0 }
  0x1d   :  { %446 = vmatpush3.bf16.xpose.msra.mxu1 %v443_v25 }
  0x1e   :  { %486 = vmatpush3.bf16.xpose.msk.msra.mxu0 %vm589_vm1, %v481_v26  ;;  %448 = vmatprep.subr.bf16.mxu1 %v447_v31 }
  0x1f   :  { %489 = vmatprep.subr.msk.bf16.mxu0 %vm589_vm1, %v487_v32 }
  0x25   :  { %450 = vmatpush3.bf16.xpose.msra.mxu1 %v447_v31 }
  0x26   :  { %492 = vmatpush3.bf16.xpose.msk.msra.mxu0 %vm589_vm1, %v487_v32  ;;  %452 = vmatprep.subr.bf16.mxu1 %v451_v37 }
  0x27   :  { %495 = vmatprep.subr.msk.bf16.mxu0 %vm589_vm1, %v493_v38 }
  0x2d   :  { %454 = vmatpush3.bf16.xpose.msra.mxu1 %v451_v37 }
  0x2e   :  { %498 = vmatpush3.bf16.xpose.msk.msra.mxu0 %vm589_vm1, %v493_v38  ;;  %456 = vmatprep.subr.bf16.mxu1 %v455_v43 }
  0x2f   :  { %501 = vmatprep.subr.msk.bf16.mxu0 %vm589_vm1, %v499_v44 }
  0x35   :  { %458 = vmatpush3.bf16.xpose.msra.mxu1 %v455_v43 }
  0x36   :  { %504 = vmatpush3.bf16.xpose.msk.msra.mxu0 %vm589_vm1, %v499_v44  ;;  %460 = vmatprep.subr.bf16.mxu1 %v459_v49 }
  0x37   :  { %507 = vmatprep.subr.msk.bf16.mxu0 %vm589_vm1, %v505_v50 }
  0x3d   :  { %462 = vmatpush3.bf16.xpose.msra.mxu1 %v459_v49 }
  0x3e   :  { %510 = vmatpush3.bf16.xpose.msk.msra.mxu0 %vm589_vm1, %v505_v50 }
  0x44   :  { %394 = vmatmul.mubr.f32.vlgmr.msra.gmra.mrb[0].mxu1 %v37_v51 }
  0x45   :  { %429 = vmatmul.mubr.msk.f32.vlgmr.msra.gmra.mrb[0].mxu0 %vm154_vm0, %v137_v52 }
 0x117   :  { %v395_v54 = vpop.f32.mrb[0].mxu1 }
 0x118   :  { %v130_v55 = vadd.f32 %v395_v54, %v306_v53  ;;  %v120_v56 = vpop.f32.mrb[1].mxu1  ;;  %v430_v57 = vpop.f32.mrb[0].mxu0 }
 0x119   :  { %v129_v58 = vadd.f32 %v306_v53, %v120_v56  ;;  %v275_v59 = vpop.f32.mrb[1].mxu0 }
 0x11a   :  { %v287_v60 = vadd.f32 %v430_v57, %v130_v55 }
 0x11b   :  { %v286_v61 = vadd.f32 %v275_v59, %v129_v58 }
 0x11c   :  { %289 = vst [vmem:[#allocation3 + $0x8] sm:$0xff] %v287_v60 }
 0x11d   :  { %288 = vst [vmem:[#allocation3] sm:$0xff] %v286_v61 }
 0x11e   :  { %529 = shalt.err (!%p526_p4)
}
 0x11f   :  { %s530_s17 = scalar_lea.hbm %s743_s5, 256 }
 0x120   :  { %p531_p5 = scmp.ne.s32.totalorder %s743_s5, %s530_s17  ;;  %p534_p6 = scmp.lt.u32.totalorder %s530_s17, %s743_s5 }
 0x122   :  { %p536_p7 = pnand %p534_p6, %p531_p5 }
 0x124   :  { %539 = shalt.err (!%p536_p7)
}
 0x125   :  { %s543_s22 = smov 128   ;;  %s544_s23 = smov 8  }
 0x126   :  { %301 = dma.vmem_to_hbm [thread:$0]  %s296_s16, 256, %s743_s5, [#allocation4], %s543_s22, %s543_s22, %s544_s23  }
 0x127   :  { %540 = dma.done.wait [#allocation4], 256  }
 0x128   :  { %541 = vsyncadd [#allocation4], 4294967040 }
 0x129   :  { %305 = vsyncpa [#allocation4], 1 }

</bundles_post_ra>
